<compile_context>
chip_gen: v5e
topology: v5e:2x2
jax: 0.10.0
libtpu: 0.0.40
codegen_flags: <defaults>
</compile_context>

<pallas_src>
import functools

import jax
import jax.numpy as jnp
import numpy as np
from jax.experimental import pallas as pl
from jax.experimental.pallas import tpu as pltpu


_NEG_INF = -1e30  # bias for padded classes -> exp underflows to 0, LSE unaffected


def _decoder_kernel(x_ref, w_ref, b_ref, o_ref):
    # x_ref: (F, tT)   f32, channels-first (NCT) time tile of one batch element
    # w_ref: (F, Cp)   bf16, kernel_size=1 conv weight; padded class columns are zero
    # b_ref: (1, Cp)   f32, bias; padded class entries are -1e30
    # o_ref: (tT, Cp)  f32, log-probabilities tile
    x = x_ref[...].astype(jnp.bfloat16)   # in-VMEM cast; MXU runs at bf16 rate
    # Contract over F (dim 0 of both operands): (F, tT) x (F, Cp) -> (tT, Cp), f32 acc.
    logits = jax.lax.dot_general(
        x,
        w_ref[...],
        dimension_numbers=(((0,), (0,)), ((), ())),
        preferred_element_type=jnp.float32,
    )
    logits = logits + b_ref[...]
    # Numerically-stable log_softmax along the lane-dense (128-wide) class axis.
    m = jnp.max(logits, axis=-1, keepdims=True)
    shifted = logits - m
    lse = jnp.log(jnp.sum(jnp.exp(shifted), axis=-1, keepdims=True))
    o_ref[...] = (shifted - lse).astype(o_ref.dtype)


@functools.partial(jax.jit, static_argnames=("t_tile",))
def jasper_decoder_for_ctc(x_nct, weight, bias, *, t_tile=512):
    """JasperDecoderForCTC.forward.

    x_nct:  (B, feat_in, T) encoder output (PyTorch NCT conv layout), f32.
    weight: (num_classes, feat_in, 1) Conv1d weight.
    bias:   (num_classes,) Conv1d bias.
    Returns (B, T, num_classes) log-probabilities, f32.
    """
    B, F, T = x_nct.shape
    C = weight.shape[0]
    Cp = ((C + 127) // 128) * 128          # class axis padded to a full lane width

    # Time tile: multiple-of-128 tile for long sequences, full T for small T.
    # At F=1024 the f32 x tile (1024 x 512) is 2 MiB -> 4 MiB double-buffered,
    # comfortably inside every generation's scoped VMEM (incl. v7x 64 MiB physical).
    tT = T if T <= t_tile else t_tile

    # Tiny parameter prep in plain JAX (weight/bias are KB-scale, one-time).
    w_fc = jnp.transpose(weight[:, :, 0], (1, 0)).astype(jnp.bfloat16)     # (F, C)
    w_fc = jnp.pad(w_fc, ((0, 0), (0, Cp - C)))                            # zero pad classes
    b_1c = jnp.concatenate(
        [bias.astype(jnp.float32), jnp.full((Cp - C,), _NEG_INF, jnp.float32)]
    ).reshape(1, Cp)

    cost = pl.CostEstimate(
        flops=2 * B * T * F * Cp,
        transcendentals=B * T * (Cp + 1),
        bytes_accessed=(x_nct.size * 4) + (w_fc.size * 2) + (b_1c.size * 4)
        + (B * T * Cp * 4),
    )

    out_padded = pl.pallas_call(
        _decoder_kernel,
        out_shape=jax.ShapeDtypeStruct((B, T, Cp), jnp.float32),
        grid_spec=pl.GridSpec(
            grid=(B, pl.cdiv(T, tT)),
            in_specs=[
                # NCT time tile; leading batch dim squeezed out of the kernel view.
                pl.BlockSpec((None, F, tT), lambda b, t: (b, 0, t)),
                pl.BlockSpec((F, Cp), lambda b, t: (0, 0)),   # weight resident
                pl.BlockSpec((1, Cp), lambda b, t: (0, 0)),   # bias resident
            ],
            out_specs=pl.BlockSpec((None, tT, Cp), lambda b, t: (b, t, 0)),
        ),
        compiler_params=pltpu.CompilerParams(
            dimension_semantics=("parallel", "parallel"),
        ),
        cost_estimate=cost,
    )(x_nct, w_fc, b_1c)

    # Drop padded classes to restore the module's (B, T, num_classes) output.
    return out_padded[:, :, :C]


if __name__ == "__main__":
    # Small shapes consistent with the module: feat_in channels, CTC classes, time axis.
    B, FEAT_IN, T, NUM_CLASSES = 2, 32, 16, 29

    key = jax.random.PRNGKey(0)
    k_x, k_w, k_b = jax.random.split(key, 3)

    # Deterministic parameter init (xavier_uniform conv weight, small uniform bias).
    fan_in, fan_out = FEAT_IN, NUM_CLASSES
    limit = float(np.sqrt(6.0 / (fan_in + fan_out)))
    weight = jax.random.uniform(
        k_w, (NUM_CLASSES, FEAT_IN, 1), minval=-limit, maxval=limit, dtype=jnp.float32
    )
    b_limit = float(1.0 / np.sqrt(fan_in))
    bias = jax.random.uniform(
        k_b, (NUM_CLASSES,), minval=-b_limit, maxval=b_limit, dtype=jnp.float32
    )

    # Encoder output (last element of the encoder tuple): (B, feat_in, T) in NCT layout.
    x = jax.random.normal(k_x, (B, FEAT_IN, T), dtype=jnp.float32)

    out = jasper_decoder_for_ctc(x, weight, bias)
    out = jax.block_until_ready(out)
    assert out.shape == (B, T, NUM_CLASSES)

    # Pure-JAX reference (apply the same bf16 rounding of x / W as the MXU path).
    x_r = x.astype(jnp.bfloat16).astype(jnp.float32)
    w_r = weight[:, :, 0].astype(jnp.bfloat16).astype(jnp.float32)
    logits_ref = jnp.einsum("bft,cf->btc", x_r, w_r) + bias[None, None, :]
    ref = jax.nn.log_softmax(logits_ref, axis=2)
    np.testing.assert_allclose(np.asarray(out), np.asarray(ref), atol=2e-3, rtol=2e-3)

    print("KERNEL_OK")
</pallas_src>

<mosaic_0001>
module attributes {stable_mosaic.version = 11 : i64} {
  func.func @_decoder_kernel(%arg0: i32, %arg1: i32, %arg2: memref<1x32x16xf32, #tpu.memory_space<vmem>>, %arg3: memref<32x128xbf16, #tpu.memory_space<vmem>>, %arg4: memref<1x128xf32, #tpu.memory_space<vmem>>, %arg5: memref<1x16x128xf32, #tpu.memory_space<vmem>>) attributes {dimension_semantics = [#tpu.dimension_semantics<parallel>, #tpu.dimension_semantics<parallel>], iteration_bounds = array<i64: 2, 1>, scalar_prefetch = 0 : i64, scratch_operands = 0 : i64, tpu.core_type = #tpu.core_type<tc>, window_params = [{transform_indices = @transform_0, window_bounds = array<i64: 1, 32, 16>}, {pipeline_mode = #tpu.pipeline_mode<synchronous>, transform_indices = @transform_1, window_bounds = array<i64: 32, 128>}, {pipeline_mode = #tpu.pipeline_mode<synchronous>, transform_indices = @transform_2, window_bounds = array<i64: 1, 128>}, {transform_indices = @transform_3, window_bounds = array<i64: 1, 16, 128>}]} {
    %c0 = arith.constant 0 : index
    %c0_0 = arith.constant 0 : index
    %c0_1 = arith.constant 0 : index
    %0 = vector.load %arg2[%c0, %c0_0, %c0_1] : memref<1x32x16xf32, #tpu.memory_space<vmem>>, vector<1x32x16xf32>
    %1 = vector.shape_cast %0 : vector<1x32x16xf32> to vector<32x16xf32>
    %2 = arith.truncf %1 : vector<32x16xf32> to vector<32x16xbf16>
    %c0_2 = arith.constant 0 : index
    %c0_3 = arith.constant 0 : index
    %3 = vector.load %arg3[%c0_2, %c0_3] : memref<32x128xbf16, #tpu.memory_space<vmem>>, vector<32x128xbf16>
    %cst = arith.constant dense<0.000000e+00> : vector<16x128xf32>
    %4 = tpu.matmul %2, %3, %cst {dimension_numbers = #tpu.dot_dimension_numbers<[0], [0], [1], [1], [0, 1, 1, 1], [], []>} : vector<32x16xbf16>, vector<32x128xbf16>, vector<16x128xf32> -> vector<16x128xf32>
    %c0_4 = arith.constant 0 : index
    %c0_5 = arith.constant 0 : index
    %5 = vector.load %arg4[%c0_4, %c0_5] : memref<1x128xf32, #tpu.memory_space<vmem>>, vector<1x128xf32>
    %6 = vector.broadcast %5 : vector<1x128xf32> to vector<16x128xf32>
    %7 = arith.addf %4, %6 : vector<16x128xf32>
    %cst_6 = arith.constant dense<0xFF800000> : vector<16xf32>
    %8 = vector.multi_reduction <maximumf>, %7, %cst_6 [1] : vector<16x128xf32> to vector<16xf32>
    %9 = vector.shape_cast %8 : vector<16xf32> to vector<16x1xf32>
    %10 = vector.broadcast %9 : vector<16x1xf32> to vector<16x128xf32>
    %11 = arith.subf %7, %10 : vector<16x128xf32>
    %12 = math.exp %11 : vector<16x128xf32>
    %cst_7 = arith.constant dense<0.000000e+00> : vector<16xf32>
    %13 = vector.multi_reduction <add>, %12, %cst_7 [1] : vector<16x128xf32> to vector<16xf32>
    %14 = vector.shape_cast %13 : vector<16xf32> to vector<16x1xf32>
    %15 = math.log %14 : vector<16x1xf32>
    %16 = vector.broadcast %15 : vector<16x1xf32> to vector<16x128xf32>
    %17 = arith.subf %11, %16 : vector<16x128xf32>
    %c0_8 = arith.constant 0 : index
    %c0_9 = arith.constant 0 : index
    %c0_10 = arith.constant 0 : index
    %18 = vector.load %arg5[%c0_8, %c0_9, %c0_10] : memref<1x16x128xf32, #tpu.memory_space<vmem>>, vector<1x16x128xf32>
    %19 = vector.shape_cast %18 : vector<1x16x128xf32> to vector<16x128xf32>
    %20 = vector.shape_cast %17 : vector<16x128xf32> to vector<1x16x128xf32>
    tpu.vector_store %arg5[%c0_8, %c0_9, %c0_10], %20 {strides = array<i32>} : memref<1x16x128xf32, #tpu.memory_space<vmem>>, vector<1x16x128xf32>,
    return
  }
  func.func @transform_0(%arg0: i32, %arg1: i32) -> (i32, i32, i32) {
    %c0_i32 = arith.constant 0 : i32
    %c0_i32_0 = arith.constant 0 : i32
    return %arg0, %c0_i32, %arg1 : i32, i32, i32
  }
  func.func @transform_1(%arg0: i32, %arg1: i32) -> (i32, i32) {
    %c0_i32 = arith.constant 0 : i32
    %c0_i32_0 = arith.constant 0 : i32
    %c0_i32_1 = arith.constant 0 : i32
    return %c0_i32, %c0_i32_0 : i32, i32
  }
  func.func @transform_2(%arg0: i32, %arg1: i32) -> (i32, i32) {
    %c0_i32 = arith.constant 0 : i32
    %c0_i32_0 = arith.constant 0 : i32
    %c0_i32_1 = arith.constant 0 : i32
    return %c0_i32, %c0_i32_0 : i32, i32
  }
  func.func @transform_3(%arg0: i32, %arg1: i32) -> (i32, i32, i32) {
    %c0_i32 = arith.constant 0 : i32
    %c0_i32_0 = arith.constant 0 : i32
    return %arg0, %arg1, %c0_i32 : i32, i32, i32
  }
}

</mosaic_0001>

<bundles_post_ra>
// kernel: jasper_decoder_for_ctc.1
= control target key start
LH: loop header
LB: loop body
LE: loop exit
PB: predicated region body
PF: predicated region fallthrough
CT: control target
= control target key end

     0   :  { %8 = vsyncpa [#allocation3], 0  ;;  %s676_s0 = inlined_call_operand.vmem [shape: f32[2,32,16], index: 0, kind: input, shape index: {}]   ;;  %s677_s1 = inlined_call_operand.vmem [shape: bf16[32,128], index: 1, kind: input, shape index: {}]   ;;  %s678_s2 = inlined_call_operand.vmem [shape: f32[1,128], index: 2, kind: input, shape index: {}]   ;;  %s679_s3 = inlined_call_operand.hbm [shape: f32[2,16,128], index: 3, kind: output, shape index: {}]  }
   0x1   :  { %10 = vsyncpa [#allocation3 + $0x1], 0  ;;  %s570_s12 = smov 0   ;;  %s572_s13 = smov 0  }
   0x2   :  { %s574_s14 = smov 0   ;;  %s576_s15 = smov 0  }
   0x3   :  { %s578_s16 = smov 0   ;;  %s580_s17 = smov 0  }
   0x4 LB: > { %s375_s18 = sadd.s32 4294967295, %s546_s17   ;;  %s376_s19 = sadd.s32 4294967294, %s546_s17   ;;  %s546_s17 = sphi %s580_s17, %s16_s17   ;;  %s542_s16 = sphi %s578_s16, %s686_s16   ;;  %s538_s15 = sphi %s576_s15, %s685_s15   ;;  %s534_s14 = sphi %s574_s14, %s684_s14   ;;  %s530_s13 = sphi %s572_s13, %s683_s13   ;;  %s526_s12 = sphi %s570_s12, %s682_s12  }
   0x5   : > { %s28_s20 = sadd.s32 1, %s542_s16  ;;  %s107_s21 = sadd.s32 1, %s534_s14 }
   0x6   : > { %p30_p0 = scmp.ge.s32.totalorder %s28_s20, 2  ;;  %p117_p1 = scmp.ne.s32.totalorder %s534_s14, %s530_s13 }
   0x7   : > { %p118_p2 = scmp.eq.s32.totalorder %s375_s18, 1  ;;  %p123_p3 = scmp.ne.s32.totalorder %s530_s13, %s526_s12 }
   0x8   : > { %s688_s20 = smov (%p30_p0, %s28_s20), 0  ;;  %p124_p5 = scmp.eq.s32.totalorder %s376_s19, 1 }
   0x9   : > { %p610_p4 = por %p118_p2, %p117_p1  ;;  %s102_s23 = ssub.s32 %s542_s16, %s688_s20 }
   0xa   : > { %p379_p6 = scmp.ge.s32.totalorder %s546_s17, 1  ;;  %p105_p7 = scmp.eq.s32.totalorder %s102_s23, 0 }
   0xb   : > { %p617_p8 = por %p124_p5, %p123_p3  ;;  %p159_p9 = scmp.lt.s32.totalorder %s546_s17, 3 }
   0xc   : > { %s623_s25 = scalar_select %p105_p7, %s534_s14, %s107_s21  }
   0xd   : > { %p160_p10 = pnand %p379_p6, %p159_p9 }
   0xe   : > { %p186_p11 = scmp.lt.s32.totalorder (!%p160_p10), %s538_s15, 1  ;;  %s183_s10 = sand.u32 (!%p160_p10), 1, %s530_s13  }
   0xf   : > { %163 = sbr.rel (%p160_p10) target bundleno = 594 (0x252), region = 32  ;;  %s380_s11 = sshll.u32 (!%p160_p10), %s183_s10, 4 }
  0x10   : > { %s400_s18 = sshll.u32 (!%p160_p10), %s538_s15, 4  ;;  %s185_s26 = scalar_lea.vmem (!%p160_p10), [#allocation2], %s380_s11 }
  0x11   : > { %s292_s23 = scalar_lea.hbm (!%p160_p10), %s679_s3, %s400_s18  ;;  %s293_s27 = sshll.u32 (!%p160_p10), %s185_s26, 4  ;;  %s294_s27 = int_to_ptr.vmem [resolvable:$true] %s293_s27 }
  0x12   : > { %s279_s29 = scalar_lea.sflag (!%p160_p10), [#allocation3], %s183_s10  ;;  %s488_s6 = scalar_lea.hbm (!%p160_p10), %s679_s3, 32 }
  0x14   : > { %v399_v0 = vld [vmem:[%s677_s1 + $0x8] sm:$0xff]  ;;  %s187_s28 = scalar_select %p186_p11, %s538_s15, 1  ;;  %v398_v1 = vld [vmem:[%s677_s1] sm:$0xff]  ;;  %vm238_vm0 = vcmask 261120  }
  0x15   : > { %248 = vmatpush.bf16.msra.mxu0 %v399_v0  ;;  %v459_v9 = vld [vmem:[%s678_s2] ss:$0 sm:$0xff] }
  0x16   : > { %s397_s4 = sshll.u32 %s187_s28, 5  ;;  %s295_s28 = sshll.u32 %s292_s23, 4  ;;  %s296_s28 = int_to_ptr.hbm [resolvable:$true] %s295_s28 }
  0x17   : > { %s193_s7 = scalar_lea.vmem %s676_s0, %s397_s4  ;;  %s482_s30 = sshra.s32 %s296_s28, 4  ;;  %s483_s30 = int_to_ptr.hbm [resolvable:$true] %s482_s30 }
  0x18   : > { %v196_v2 = vld [vmem:[%s193_s7] sm:$0xff]  ;;  %v197_v3 = vld [vmem:[%s193_s7 + $0x8] sm:$0xff]  ;;  %v198_v5 = vld [vmem:[%s193_s7 + $0x10] sm:$0xff]  ;;  %s484_s15 = scalar_lea.hbm %s483_s30, 16  ;;  %p489_p1 = scmp.lt.s32.totalorder %s483_s30, %s679_s3 }
  0x19   : > { %249 = vmatpush.bf16.msra.mxu0 %v398_v1  ;;  %v200_v4 = vpack.c.bf16 %v197_v3, %v196_v2  ;;  %v199_v6 = vld [vmem:[%s193_s7 + $0x18] sm:$0xff]  ;;  %p485_p12 = scmp.ne.s32.totalorder %s483_s30, %s484_s15  ;;  %p490_p2 = scmp.lt.s32.totalorder %s488_s6, %s484_s15 }
  0x1a   : > { %v201_v7 = vpack.c.bf16 %v199_v6, %v198_v5 }
  0x1b   : > { %210 = vxpose.xlu0.c.b16.start [1/2] (short) (narrow) %v200_v4, 16  ;;  %p486_p13 = pnand %p485_p12, %p610_p4  ;;  %p491_p3 = por %p490_p2, %p489_p1 }
  0x1d   : > { %p487_p0 = pneg %p486_p13 }
  0x1f   : > { %p492_p5 = pnand %p491_p3, %p487_p0 }
  0x2b   : > { %211 = vxpose.xlu0.c.b16.end [2/2] (short) (narrow) %v201_v7, 16 }
  0xc7   : > { %v218_v8 = vpop.trf.xlu0 }
  0xc8   : > { %391 = vmatmul.msk.bf16.vlgmr.msra.gmra.mxu0 %vm238_vm0, %v218_v8 }
 0x145   : > { %v251_v10 = vpop.f32.mrf.mxu0 }
 0x146   : > { %v252_v11 = vadd.f32 %v459_v9, %v251_v10 }
 0x148   : > { %256 = vmax.xlane.f32.xlu1 %v252_v11 }
 0x14d   : > { %v253_v12 = vpop.f32.mrf.mxu0 }
 0x14e   : > { %v254_v13 = vadd.f32 %v459_v9, %v253_v12 }
 0x150   : > { %258 = vmax.xlane.f32.xlu1 %v254_v13 }
 0x1bb   : > { %v257_v14 = vpop.xlane.xlu1 %256 }
 0x1bc   : > { %v260_v15 = vsub.f32 %v252_v11, %v257_v14 }
 0x1be   : > { %v262_v16 = vmul.f32 1.442695, %v260_v15 }
 0x1c0   : > { %460 = vpow2.f32 %v262_v16 }
 0x1c3   : > { %v259_v17 = vpop.xlane.xlu1 %258 }
 0x1c4   : > { %v261_v18 = vsub.f32 %v254_v13, %v259_v17 }
 0x1c6   : > { %v461_v19 = vpop.eup %460  ;;  %v264_v20 = vmul.f32 1.442695, %v261_v18 }
 0x1c7   : > { %266 = vadd.xlane.f32.xlu2 %v461_v19 }
 0x1c8   : > { %462 = vpow2.f32 %v264_v20 }
 0x1ce   : > { %v463_v21 = vpop.eup %462 }
 0x1cf   : > { %268 = vadd.xlane.f32.xlu2 %v463_v21 }
 0x23a   : > { %v267_v22 = vpop.xlane.xlu2 %266 }
 0x23b   : > { %464 = vlog2.f32 %v267_v22 }
 0x241   : > { %v465_v23 = vpop.eup %464 }
 0x242   : > { %v271_v24 = vmul.f32 0.6931472, %v465_v23  ;;  %v269_v25 = vpop.xlane.xlu2 %268 }
 0x243   : > { %466 = vlog2.f32 %v269_v25 }
 0x244   : > { %v274_v26 = vsub.f32 %v260_v15, %v271_v24 }
 0x246   : > { %276 = vst [vmem:[%s185_s26] sm:$0xff] %v274_v26 }
 0x249   : > { %v467_v27 = vpop.eup %466 }
 0x24a   : > { %v273_v28 = vmul.f32 0.6931472, %v467_v27 }
 0x24c   : > { %v275_v29 = vsub.f32 %v261_v18, %v273_v28 }
 0x24e   : > { %277 = vst [vmem:[%s185_s26 + $0x8] sm:$0xff] %v275_v29 }
 0x24f   : > { %495 = shalt.err (!%p492_p5)
}
 0x250   : > { %s548_s9 = smov 128   ;;  %s549_s10 = smov 8  }
 0x251   : > { %401 = dma.vmem_to_hbm [thread:$0]  (%p610_p4), %s294_s27, 256, %s296_s28, %s279_s29, %s548_s9, %s548_s9, %s549_s10  }
 0x252 PF: > { %p407_p6 = scmp.ge.s32.totalorder %s546_s17, 2  ;;  %s310_s11 = sand.u32 1, %s526_s12  }
 0x253   : > { %s311_s18 = scalar_lea.sflag [#allocation3], %s310_s11 }
 0x254   : > { %p404_p7 = pnand %p407_p6, %p617_p8 }
 0x256   : > { %p405_p9 = pneg %p404_p7 }
 0x258   : > { %521 = dma.done.wait (%p405_p9), %s311_s18, 256  }
 0x259   : > { %523 = vsyncadd (%p405_p9), %s311_s18, 4294967040  ;;  %s16_s17 = sadd.s32 1, %s546_s17   ;;  %s682_s12 = smov %s530_s13 }
 0x25a   : > { %p13_p10 = scmp.ge.s32.totalorder %s16_s17, 4   ;;  %s683_s13 = smov %s534_s14 }
 0x25b   : > { %s684_s14 = smov %s623_s25  ;;  %s685_s15 = smov %s542_s16 }
 0x25c   : > { %s686_s16 = smov %s688_s20  ;;  %15 = sbr.rel (!%p13_p10) target bundleno = 4 (0x4), region = 67 }
 0x261   :  { %317 = vsyncpa [#allocation3], 1 }
 0x262   :  { %319 = vsyncpa [#allocation3 + $0x1], 1 }

</bundles_post_ra>
